<compile_context>
chip_gen: v6e
topology: v6e:2x2x1
jax: 0.10.0
libtpu: 0.0.40
codegen_flags: <defaults>
</compile_context>

<pallas_src>
import functools

import jax
import jax.numpy as jnp
from jax.experimental import pallas as pl
from jax.experimental.pallas import tpu as pltpu

EPS = 1e-5
_VMEM_LIMIT = 32 * 1024 * 1024  # safe on v5e/v6e (128 MiB phys) and v7x (64 MiB phys)


def _stats_kernel(pivot_ref, x_ref, acc_ref, *, tiles_per_split, tile_rows, batch):
    """Accumulate per-feature sum / sum-of-squares of (x - pivot) over the batch.

    pivot_ref: (1, F)   per-feature shift (first row of x) -> robust variance.
    x_ref:     (tile_rows, F) natural-layout block (contiguous in HBM).
    acc_ref:   (2, F)   resident accumulator for this split: row 0 = sum, row 1 = sumsq.
    """
    s = pl.program_id(0)          # megacore split index ("parallel")
    i = pl.program_id(1)          # tile index within split ("arbitrary")

    @pl.when(i == 0)
    def _init():
        acc_ref[...] = jnp.zeros_like(acc_ref)

    x = x_ref[...].astype(jnp.float32) - pivot_ref[...]      # (tile_rows, F), shifted
    start = (s * tiles_per_split + i) * tile_rows             # global row offset
    valid = batch - start                                      # #real rows in this tile

    def _accumulate(xv):
        acc_ref[0:1, :] += jnp.sum(xv, axis=0, keepdims=True)        # sublane reduce
        acc_ref[1:2, :] += jnp.sum(xv * xv, axis=0, keepdims=True)

    # Full tiles take the cheap unmasked path; only the ragged tail / fully-out-of-range
    # tiles (possible because the grid is padded to 2 splits) pay for the row mask.
    @pl.when(valid >= tile_rows)
    def _full():
        _accumulate(x)

    @pl.when(valid < tile_rows)
    def _partial():
        rows = jax.lax.broadcasted_iota(jnp.int32, x.shape, 0)
        _accumulate(jnp.where(rows < valid, x, 0.0))


def _apply_kernel(c_ref, const_ref, x_ref, o_ref):
    """out = sigmoid(x @ c + const): BN affine + Linear folded into (c, const)."""
    x = x_ref[...].astype(jnp.float32)                                  # (tile, F)
    logits = jnp.dot(x, c_ref[...],                                     # MXU, (tile, 1)
                     preferred_element_type=jnp.float32,
                     precision=jax.lax.Precision.HIGHEST)
    logits = logits + const_ref[0, 0]                                   # SMEM scalar
    o_ref[...] = jax.nn.sigmoid(logits).astype(o_ref.dtype)             # exact sigmoid


def discriminator_r_german(x, gamma, beta, weight, bias, *,
                           stats_tile=16384, apply_tile=8192):
    """x: (B, 21) float. Returns (B, 1) float32 (PyTorch training-mode forward)."""
    B, F = x.shape

    def _tile(requested):
        if B <= requested:
            return B, 1                      # single full-array block (no constraints)
        t = max((requested // 8) * 8, 8)     # sublane dim must be a multiple of 8
        return t, pl.cdiv(B, t)

    # ---------------- pass 1: per-feature (shifted) sum / sum-of-squares -------------
    tile_s, nt_s = _tile(stats_tile)
    n_split = 2 if nt_s >= 2 else 1          # v7x has 2 TensorCores; harmless elsewhere
    tiles_per_split = pl.cdiv(nt_s, n_split)

    pivot = x[0:1, :].astype(jnp.float32)    # (1, F) per-feature shift for stable var

    stats = pl.pallas_call(
        functools.partial(_stats_kernel, tiles_per_split=tiles_per_split,
                          tile_rows=tile_s, batch=B),
        out_shape=jax.ShapeDtypeStruct((n_split, 2, F), jnp.float32),
        grid=(n_split, tiles_per_split),
        in_specs=[
            pl.BlockSpec((1, F), lambda s, i: (0, 0)),                      # pivot
            pl.BlockSpec((tile_s, F), lambda s, i: (s * tiles_per_split + i, 0)),  # x
        ],
        out_specs=pl.BlockSpec((None, 2, F), lambda s, i: (s, 0, 0)),
        compiler_params=pltpu.CompilerParams(
            dimension_semantics=("parallel", "arbitrary"),
            vmem_limit_bytes=_VMEM_LIMIT),
    )(pivot, x)

    # ---------------- O(F) glue: fold BN affine + Linear into scale c + offset -------
    sums = jnp.sum(stats, axis=0)                       # combine per-core partials (2,F)
    w = weight.reshape(F).astype(jnp.float32)
    g = gamma.reshape(F).astype(jnp.float32)
    bt = beta.reshape(F).astype(jnp.float32)
    b0 = bias.reshape(()).astype(jnp.float32)

    mean_shift = sums[0] / B                            # E[x - pivot]
    mean = pivot[0] + mean_shift                        # E[x]
    var = jnp.maximum(sums[1] / B - mean_shift * mean_shift, 0.0)   # biased batch var
    c = jax.lax.rsqrt(var + EPS) * g * w                # (F,)
    const = jnp.dot(bt, w) + b0 - jnp.dot(mean, c)      # scalar

    c2 = c.reshape(F, 1)
    const2 = const.reshape(1, 1)

    # ---------------- pass 2: fused scale + reduce (MXU) + sigmoid -------------------
    tile_a, nt_a = _tile(apply_tile)
    out = pl.pallas_call(
        _apply_kernel,
        out_shape=jax.ShapeDtypeStruct((B, 1), jnp.float32),
        grid=(nt_a,),
        in_specs=[
            pl.BlockSpec((F, 1), lambda i: (0, 0)),                  # fused scale (VMEM)
            pl.BlockSpec(memory_space=pltpu.MemorySpace.SMEM),       # scalar offset
            pl.BlockSpec((tile_a, F), lambda i: (i, 0)),             # x block
        ],
        out_specs=pl.BlockSpec((tile_a, 1), lambda i: (i, 0)),
        compiler_params=pltpu.CompilerParams(
            dimension_semantics=("parallel",),
            vmem_limit_bytes=_VMEM_LIMIT),
    )(c2, const2, x)

    return out


def _reference(x, gamma, beta, weight, bias):
    x = x.astype(jnp.float32)
    mean = jnp.mean(x, axis=0, keepdims=True)
    var = jnp.mean((x - mean) ** 2, axis=0, keepdims=True)
    xn = (x - mean) / jnp.sqrt(var + EPS) * gamma.reshape(1, -1) + beta.reshape(1, -1)
    logits = xn @ weight.reshape(-1, 1) + bias.reshape(1, 1)
    return jax.nn.sigmoid(logits)


if __name__ == "__main__":
    key = jax.random.PRNGKey(0)
    k_x, k_x2, k_w, k_b, k_g, k_be = jax.random.split(key, 6)

    F = 21

    # Deterministic parameters (shapes match the PyTorch module).
    gamma = jnp.ones((F,), jnp.float32) + 0.1 * jax.random.normal(k_g, (F,), jnp.float32)
    beta = 0.1 * jax.random.normal(k_be, (F,), jnp.float32)
    bound = 1.0 / jnp.sqrt(float(F))
    weight = jax.random.uniform(k_w, (1, F), jnp.float32, -bound, bound)
    bias = jax.random.uniform(k_b, (1,), jnp.float32, -bound, bound)

    # Small test (B=8): single-block path.  NOTE: at this size the op is launch-overhead
    # bound; in production it should be fused into a larger kernel.  Kept to validate
    # the kernel itself.
    B1 = 8
    x1 = jax.random.normal(k_x, (B1, F), dtype=jnp.float32)
    out1 = jax.block_until_ready(discriminator_r_german(x1, gamma, beta, weight, bias))
    ref1 = _reference(x1, gamma, beta, weight, bias)
    assert out1.shape == (B1, 1), out1.shape
    assert jnp.allclose(out1, ref1, atol=1e-3, rtol=1e-3), (out1, ref1)

    # Multi-tile test (B=257, tiles of 64 rows): exercises the megacore split, the
    # ragged-tail masking, the empty-tile masking, and the shifted-variance path
    # (non-zero feature means).
    B2 = 257
    x2 = 3.0 + jax.random.normal(k_x2, (B2, F), dtype=jnp.float32)
    out2 = jax.block_until_ready(
        discriminator_r_german(x2, gamma, beta, weight, bias,
                               stats_tile=64, apply_tile=64))
    ref2 = _reference(x2, gamma, beta, weight, bias)
    assert out2.shape == (B2, 1), out2.shape
    assert jnp.allclose(out2, ref2, atol=1e-3, rtol=1e-3), (out2, ref2)

    print("KERNEL_OK")
</pallas_src>

<mosaic_0001>
module attributes {stable_mosaic.version = 11 : i64} {
  func.func @_stats_kernel(%arg0: i32, %arg1: i32, %arg2: memref<1x21xf32, #tpu.memory_space<vmem>>, %arg3: memref<8x21xf32, #tpu.memory_space<vmem>>, %arg4: memref<1x2x21xf32, #tpu.memory_space<vmem>>) attributes {dimension_semantics = [#tpu.dimension_semantics<parallel>, #tpu.dimension_semantics<arbitrary>], iteration_bounds = array<i64: 1, 1>, scalar_prefetch = 0 : i64, scratch_operands = 0 : i64, tpu.core_type = #tpu.core_type<tc>, window_params = [{pipeline_mode = #tpu.pipeline_mode<synchronous>, transform_indices = @transform_0, window_bounds = array<i64: 1, 21>}, {transform_indices = @transform_1, window_bounds = array<i64: 8, 21>}, {transform_indices = @transform_2, window_bounds = array<i64: 1, 2, 21>}]} {
    %c0_i32 = arith.constant 0 : i32
    %0 = arith.cmpi eq, %arg1, %c0_i32 : i32
    %1 = arith.extui %0 : i1 to i32
    %c0_i32_0 = arith.constant 0 : i32
    %2 = arith.cmpi ne, %1, %c0_i32_0 : i32
    scf.if %2 {
      %cst = arith.constant 0.000000e+00 : f32
      %17 = vector.broadcast %cst : f32 to vector<2x21xf32>
      %c0_9 = arith.constant 0 : index
      %c0_10 = arith.constant 0 : index
      %c0_11 = arith.constant 0 : index
      %18 = vector.load %arg4[%c0_9, %c0_10, %c0_11] : memref<1x2x21xf32, #tpu.memory_space<vmem>>, vector<1x2x21xf32>
      %19 = vector.shape_cast %18 : vector<1x2x21xf32> to vector<2x21xf32>
      %20 = vector.shape_cast %17 : vector<2x21xf32> to vector<1x2x21xf32>
      tpu.vector_store %arg4[%c0_9, %c0_10, %c0_11], %20 {strides = array<i32>} : memref<1x2x21xf32, #tpu.memory_space<vmem>>, vector<1x2x21xf32>,
    } else {
    }
    %c0 = arith.constant 0 : index
    %c0_1 = arith.constant 0 : index
    %3 = vector.load %arg3[%c0, %c0_1] : memref<8x21xf32, #tpu.memory_space<vmem>>, vector<8x21xf32>
    %c0_2 = arith.constant 0 : index
    %c0_3 = arith.constant 0 : index
    %4 = vector.load %arg2[%c0_2, %c0_3] : memref<1x21xf32, #tpu.memory_space<vmem>>, vector<1x21xf32>
    %5 = vector.broadcast %4 : vector<1x21xf32> to vector<8x21xf32>
    %6 = arith.subf %3, %5 : vector<8x21xf32>
    %c1_i32 = arith.constant 1 : i32
    %7 = arith.muli %arg0, %c1_i32 : i32
    %8 = arith.addi %7, %arg1 : i32
    %c8_i32 = arith.constant 8 : i32
    %9 = arith.muli %8, %c8_i32 : i32
    %c8_i32_4 = arith.constant 8 : i32
    %10 = arith.subi %c8_i32_4, %9 : i32
    %c8_i32_5 = arith.constant 8 : i32
    %11 = arith.cmpi sge, %10, %c8_i32_5 : i32
    %12 = arith.extui %11 : i1 to i32
    %c0_i32_6 = arith.constant 0 : i32
    %13 = arith.cmpi ne, %12, %c0_i32_6 : i32
    scf.if %13 {
      %c0_9 = arith.constant 0 : index
      %c0_10 = arith.constant 0 : index
      %c0_11 = arith.constant 0 : index
      %17 = vector.load %arg4[%c0_9, %c0_10, %c0_11] : memref<1x2x21xf32, #tpu.memory_space<vmem>>, vector<1x1x21xf32>
      %18 = vector.shape_cast %17 : vector<1x1x21xf32> to vector<1x21xf32>
      %cst = arith.constant dense<0.000000e+00> : vector<21xf32>
      %19 = vector.multi_reduction <add>, %6, %cst [0] : vector<8x21xf32> to vector<21xf32>
      %20 = vector.shape_cast %19 : vector<21xf32> to vector<1x21xf32>
      %21 = arith.addf %18, %20 : vector<1x21xf32>
      %c0_12 = arith.constant 0 : index
      %c0_13 = arith.constant 0 : index
      %c0_14 = arith.constant 0 : index
      %22 = vector.load %arg4[%c0_12, %c0_13, %c0_14] : memref<1x2x21xf32, #tpu.memory_space<vmem>>, vector<1x1x21xf32>
      %23 = vector.shape_cast %22 : vector<1x1x21xf32> to vector<1x21xf32>
      %24 = vector.shape_cast %21 : vector<1x21xf32> to vector<1x1x21xf32>
      tpu.vector_store %arg4[%c0_12, %c0_13, %c0_14], %24 {strides = array<i32>} : memref<1x2x21xf32, #tpu.memory_space<vmem>>, vector<1x1x21xf32>,
      %c0_15 = arith.constant 0 : index
      %c1 = arith.constant 1 : index
      %c0_16 = arith.constant 0 : index
      %25 = vector.load %arg4[%c0_15, %c1, %c0_16] : memref<1x2x21xf32, #tpu.memory_space<vmem>>, vector<1x1x21xf32>
      %26 = vector.shape_cast %25 : vector<1x1x21xf32> to vector<1x21xf32>
      %27 = arith.mulf %6, %6 : vector<8x21xf32>
      %cst_17 = arith.constant dense<0.000000e+00> : vector<21xf32>
      %28 = vector.multi_reduction <add>, %27, %cst_17 [0] : vector<8x21xf32> to vector<21xf32>
      %29 = vector.shape_cast %28 : vector<21xf32> to vector<1x21xf32>
      %30 = arith.addf %26, %29 : vector<1x21xf32>
      %c0_18 = arith.constant 0 : index
      %c1_19 = arith.constant 1 : index
      %c0_20 = arith.constant 0 : index
      %31 = vector.load %arg4[%c0_18, %c1_19, %c0_20] : memref<1x2x21xf32, #tpu.memory_space<vmem>>, vector<1x1x21xf32>
      %32 = vector.shape_cast %31 : vector<1x1x21xf32> to vector<1x21xf32>
      %33 = vector.shape_cast %30 : vector<1x21xf32> to vector<1x1x21xf32>
      tpu.vector_store %arg4[%c0_18, %c1_19, %c0_20], %33 {strides = array<i32>} : memref<1x2x21xf32, #tpu.memory_space<vmem>>, vector<1x1x21xf32>,
    } else {
    }
    %c8_i32_7 = arith.constant 8 : i32
    %14 = arith.cmpi slt, %10, %c8_i32_7 : i32
    %15 = arith.extui %14 : i1 to i32
    %c0_i32_8 = arith.constant 0 : i32
    %16 = arith.cmpi ne, %15, %c0_i32_8 : i32
    scf.if %16 {
      %17 = tpu.iota {dimensions = array<i32: 0>} : vector<8x21xi32>
      %18 = vector.broadcast %10 : i32 to vector<8x21xi32>
      %19 = arith.cmpi slt, %17, %18 : vector<8x21xi32>
      %cst = arith.constant 0.000000e+00 : f32
      %20 = vector.broadcast %cst : f32 to vector<8x21xf32>
      %21 = arith.select %19, %6, %20 : vector<8x21xi1>, vector<8x21xf32>
      %c0_9 = arith.constant 0 : index
      %c0_10 = arith.constant 0 : index
      %c0_11 = arith.constant 0 : index
      %22 = vector.load %arg4[%c0_9, %c0_10, %c0_11] : memref<1x2x21xf32, #tpu.memory_space<vmem>>, vector<1x1x21xf32>
      %23 = vector.shape_cast %22 : vector<1x1x21xf32> to vector<1x21xf32>
      %cst_12 = arith.constant dense<0.000000e+00> : vector<21xf32>
      %24 = vector.multi_reduction <add>, %21, %cst_12 [0] : vector<8x21xf32> to vector<21xf32>
      %25 = vector.shape_cast %24 : vector<21xf32> to vector<1x21xf32>
      %26 = arith.addf %23, %25 : vector<1x21xf32>
      %c0_13 = arith.constant 0 : index
      %c0_14 = arith.constant 0 : index
      %c0_15 = arith.constant 0 : index
      %27 = vector.load %arg4[%c0_13, %c0_14, %c0_15] : memref<1x2x21xf32, #tpu.memory_space<vmem>>, vector<1x1x21xf32>
      %28 = vector.shape_cast %27 : vector<1x1x21xf32> to vector<1x21xf32>
      %29 = vector.shape_cast %26 : vector<1x21xf32> to vector<1x1x21xf32>
      tpu.vector_store %arg4[%c0_13, %c0_14, %c0_15], %29 {strides = array<i32>} : memref<1x2x21xf32, #tpu.memory_space<vmem>>, vector<1x1x21xf32>,
      %c0_16 = arith.constant 0 : index
      %c1 = arith.constant 1 : index
      %c0_17 = arith.constant 0 : index
      %30 = vector.load %arg4[%c0_16, %c1, %c0_17] : memref<1x2x21xf32, #tpu.memory_space<vmem>>, vector<1x1x21xf32>
      %31 = vector.shape_cast %30 : vector<1x1x21xf32> to vector<1x21xf32>
      %32 = arith.mulf %21, %21 : vector<8x21xf32>
      %cst_18 = arith.constant dense<0.000000e+00> : vector<21xf32>
      %33 = vector.multi_reduction <add>, %32, %cst_18 [0] : vector<8x21xf32> to vector<21xf32>
      %34 = vector.shape_cast %33 : vector<21xf32> to vector<1x21xf32>
      %35 = arith.addf %31, %34 : vector<1x21xf32>
      %c0_19 = arith.constant 0 : index
      %c1_20 = arith.constant 1 : index
      %c0_21 = arith.constant 0 : index
      %36 = vector.load %arg4[%c0_19, %c1_20, %c0_21] : memref<1x2x21xf32, #tpu.memory_space<vmem>>, vector<1x1x21xf32>
      %37 = vector.shape_cast %36 : vector<1x1x21xf32> to vector<1x21xf32>
      %38 = vector.shape_cast %35 : vector<1x21xf32> to vector<1x1x21xf32>
      tpu.vector_store %arg4[%c0_19, %c1_20, %c0_21], %38 {strides = array<i32>} : memref<1x2x21xf32, #tpu.memory_space<vmem>>, vector<1x1x21xf32>,
    } else {
    }
    return
  }
  func.func @transform_0(%arg0: i32, %arg1: i32) -> (i32, i32) {
    %c0_i32 = arith.constant 0 : i32
    %c0_i32_0 = arith.constant 0 : i32
    %c0_i32_1 = arith.constant 0 : i32
    return %c0_i32, %c0_i32_0 : i32, i32
  }
  func.func @transform_1(%arg0: i32, %arg1: i32) -> (i32, i32) {
    %c1_i32 = arith.constant 1 : i32
    %0 = arith.muli %arg0, %c1_i32 : i32
    %1 = arith.addi %0, %arg1 : i32
    %c0_i32 = arith.constant 0 : i32
    %c0_i32_0 = arith.constant 0 : i32
    return %1, %c0_i32 : i32, i32
  }
  func.func @transform_2(%arg0: i32, %arg1: i32) -> (i32, i32, i32) {
    %c0_i32 = arith.constant 0 : i32
    %c0_i32_0 = arith.constant 0 : i32
    %c0_i32_1 = arith.constant 0 : i32
    return %arg0, %c0_i32, %c0_i32_0 : i32, i32, i32
  }
}

</mosaic_0001>

<bundles_post_ra>
// kernel: tpu_custom_call.1
= control target key start
LH: loop header
LB: loop body
LE: loop exit
PB: predicated region body
PF: predicated region fallthrough
CT: control target
= control target key end

     0   :  { %7 = vsyncpa [#allocation3], 0  ;;  %s232_s0 = inlined_call_operand.hbm [shape: f32[1,21], index: 0, kind: input, shape index: {}]   ;;  %s233_s1 = inlined_call_operand.hbm [shape: f32[8,21], index: 1, kind: input, shape index: {}]   ;;  %s234_s2 = inlined_call_operand.hbm [shape: f32[1,2,21], index: 2, kind: output, shape index: {}]  }
   0x1   :  { %8 = vsyncpa [#allocation6], 0 }
   0x2   :  { %9 = vsyncpa [#allocation4], 0  ;;  %s204_s9 = smov [#allocation2]   ;;  %s205_s11 = smov [#allocation5]  }
   0x3   :  { %s16_s10 = sshll.u32 %s204_s9, 4  ;;  %s29_s12 = sshll.u32 %s205_s11, 4  ;;  %s17_s10 = int_to_ptr.vmem [resolvable:$true] %s16_s10  ;;  %s30_s12 = int_to_ptr.vmem [resolvable:$true] %s29_s12 }
   0x4   :  { %s146_s13 = scalar_lea.vmem %s17_s10, 16  ;;  %s150_s14 = scalar_lea.vmem %s17_s10, 32 }
   0x5   :  { %p147_p0 = scmp.ne.s32.totalorder %s17_s10, %s146_s13  ;;  %p151_p1 = scmp.lt.s32.totalorder %s17_s10, %s17_s10 }
   0x6   :  { %p152_p2 = scmp.lt.s32.totalorder %s150_s14, %s146_s13 }
   0x8   :  { %p153_p3 = por %p152_p2, %p151_p1 }
   0xa   :  { %p154_p4 = pnand %p153_p3, %p147_p0 }
   0xc   :  { %157 = shalt.err (!%p154_p4)
}
   0xd   :  { %19 = dma.hbm_to_vmem [thread:$0]  %s232_s0, 16, %s17_s10, [#allocation3]  }
   0xe   :  { %s166_s17 = scalar_lea.vmem %s30_s12, 128  ;;  %p171_p6 = scmp.lt.s32.totalorder %s30_s12, %s30_s12 }
   0xf   :  { %p167_p5 = scmp.ne.s32.totalorder %s30_s12, %s166_s17  ;;  %p172_p7 = scmp.lt.s32.totalorder %s166_s17, %s166_s17 }
  0x11   :  { %p173_p8 = por %p172_p7, %p171_p6 }
  0x13   :  { %p174_p9 = pnand %p173_p8, %p167_p5 }
  0x15   :  { %177 = shalt.err (!%p174_p9)
}
  0x16   :  { %32 = dma.hbm_to_vmem [thread:$0]  %s233_s1, 128, %s30_s12, [#allocation6]  }
  0x17   :  { %198 = dma.done.wait [#allocation3], 16  }
  0x18   :  { %199 = vsyncadd [#allocation3], 4294967280 }
  0x19   :  { %200 = dma.done.wait [#allocation6], 128  }
  0x1a   :  { %201 = vsyncadd [#allocation6], 4294967168  ;;  %vm44_vm0 = vcmask 164864   ;;  %v206_v0 = vmov 0.0   ;;  %v46_v1 = vld [vmem:[#allocation5] sm:$0xff]  ;;  %vm63_vm1 = vcmask 171008  }
  0x1b   :  { %45 = vst.msk [vmem:[#allocation7] sm:$0x3] %vm44_vm0, %v206_v0  ;;  %v133_v2 = vld [vmem:[#allocation2] ss:$0 sm:$0xff]  ;;  %vm72_vm2 = vcmask 163840   ;;  %s207_s0 = smov [#allocation7]  }
  0x1c   :  { %v54_v3 = vsub.f32 %v46_v1, %v133_v2  ;;  %s123_s1 = sshll.u32 %s207_s0, 4  ;;  %s124_s1 = int_to_ptr.vmem [resolvable:$true] %s123_s1 }
  0x1d   :  { %s178_s20 = scalar_lea.vmem %s124_s1, 32  ;;  %p183_p11 = scmp.lt.s32.totalorder %s124_s1, %s124_s1 }
  0x1e   :  { %v64_v4 = vsel %vm63_vm1, %v54_v3, 0.0  ;;  %v75_v5 = vmul.f32 %v54_v3, %v54_v3  ;;  %p179_p10 = scmp.ne.s32.totalorder %s124_s1, %s178_s20  ;;  %p184_p12 = scmp.lt.s32.totalorder %s178_s20, %s178_s20 }
  0x1f   :  { %v65_v6 = vrot.slane %v64_v4, 4 }
  0x20   :  { %v76_v7 = vsel %vm63_vm1, %v75_v5, 0.0  ;;  %p185_p13 = por %p184_p12, %p183_p11 }
  0x21   :  { %v66_v8 = vadd.f32 %v65_v6, %v64_v4  ;;  %v77_v9 = vrot.slane %v76_v7, 4 }
  0x22   :  { %v62_v16 = vld [vmem:[#allocation7] sm:$0x1]  ;;  %v74_v19 = vld [vmem:[#allocation7 + $0x1] sm:$0x1]  ;;  %p186_p0 = pnand %p185_p13, %p179_p10 }
  0x23   :  { %v67_v10 = vrot.slane %v66_v8, 2  ;;  %v78_v11 = vadd.f32 %v77_v9, %v76_v7 }
  0x25   :  { %v68_v12 = vadd.f32 %v67_v10, %v66_v8  ;;  %v79_v13 = vrot.slane %v78_v11, 2 }
  0x27   :  { %v69_v14 = vrot.slane %v68_v12, 1  ;;  %v80_v15 = vadd.f32 %v79_v13, %v78_v11 }
  0x29   :  { %v70_v17 = vadd.f32 %v69_v14, %v68_v12  ;;  %v81_v18 = vrot.slane %v80_v15, 1 }
  0x2b   :  { %v71_v20 = vadd.f32 %v70_v17, %v62_v16  ;;  %v82_v21 = vadd.f32 %v81_v18, %v80_v15 }
  0x2d   :  { %73 = vst.msk [vmem:[#allocation7] sm:$0x1] %vm72_vm2, %v71_v20  ;;  %v83_v22 = vadd.f32 %v82_v21, %v74_v19 }
  0x2f   :  { %84 = vst.msk [vmem:[#allocation7 + $0x1] sm:$0x1] %vm72_vm2, %v83_v22 }
  0x30   :  { %189 = shalt.err (!%p186_p0)
}
  0x31   :  { %126 = dma.vmem_to_hbm [thread:$0]  %s124_s1, 32, %s234_s2, [#allocation4]  }
  0x32   :  { %202 = dma.done.wait [#allocation4], 32  }
  0x33   :  { %203 = vsyncadd [#allocation4], 4294967264 }
  0x34   :  { %130 = vsyncpa [#allocation3], 1 }
  0x35   :  { %131 = vsyncpa [#allocation6], 1 }
  0x36   :  { %132 = vsyncpa [#allocation4], 1 }

</bundles_post_ra>
